<compile_context>
chip_gen: v7x
topology: tpu7x:2x2x1
jax: 0.10.0
libtpu: 0.0.40
codegen_flags: <defaults>
</compile_context>

<pallas_src>
import jax
import jax.numpy as jnp
from jax.experimental import pallas as pl
from jax.experimental.pallas import tpu as pltpu

MATMUL_DTYPE = jnp.bfloat16      # MXU-native operand dtype on v5e/v6e/v7x


def _make_fused_kernel(seg_len, fuse_taps):
    """seg_len = per-sequence length L (static).  fuse_taps => single K=3*C2
    matmul (requires C2 % 8 == 0 so the sublane tap-concat is aligned)."""

    def kernel(x_ref, w1_ref, b1_ref, w2_ref, b2_ref, o_ref, mask_ref):
        r = pl.program_id(1)                    # repeat id (inner, "arbitrary")
        c2 = w1_ref.shape[0]
        gw = x_ref.shape[-1]                    # group lane width = (N/G)*L

        @pl.when(r == 0)
        def _():
            # Activation becomes resident in the output block for this group.
            o_ref[...] = x_ref[...]
            # Hoisted, loop-invariant k=3 boundary masks: zero the columns where
            # a shifted tap crosses a sequence (== batch) boundary / the conv
            # zero-padding.
            lane = jax.lax.broadcasted_iota(jnp.int32, (1, gw), 1) % seg_len
            mask_ref[0:1, :] = (lane != 0).astype(jnp.float32)            # h[l-1] valid
            mask_ref[1:2, :] = (lane != seg_len - 1).astype(jnp.float32)  # h[l+1] valid

        x = o_ref[...].astype(jnp.float32)      # (C, gw) resident across repeats

        # --- CNNBlock 1: Conv1d(C -> C//2, k=1), BN scale pre-folded into w1 ---
        h = jnp.dot(w1_ref[...], x.astype(MATMUL_DTYPE),
                    preferred_element_type=jnp.float32)                   # (C2, gw)
        h = h + b1_ref[...]
        h = jnp.maximum(h, 0.1 * h)                                       # LeakyReLU(0.1)

        # --- CNNBlock 2: Conv1d(C//2 -> C, k=3, pad=1), BN scale pre-folded ---
        # Shifted copies of h; precomputed masks implement the zero padding and
        # zero the cross-batch columns introduced by flattening N into lanes.
        h_left = (jnp.roll(h, 1, axis=1) * mask_ref[0:1, :]).astype(MATMUL_DTYPE)
        h_ctr = h.astype(MATMUL_DTYPE)
        h_right = (jnp.roll(h, -1, axis=1) * mask_ref[1:2, :]).astype(MATMUL_DTYPE)

        if fuse_taps:
            # One MXU pass: K = 3*C2, taps stacked on sublanes (aligned, C2%8==0).
            hk = jnp.concatenate([h_left, h_ctr, h_right], axis=0)        # (3*C2, gw)
            y = jnp.dot(w2_ref[...], hk, preferred_element_type=jnp.float32)
        else:
            # Tiny / non-8-aligned C2: three accumulated 1x1 matmuls,
            # taps read through the ref one at a time.
            y = (jnp.dot(w2_ref[0], h_left, preferred_element_type=jnp.float32)
                 + jnp.dot(w2_ref[1], h_ctr, preferred_element_type=jnp.float32)
                 + jnp.dot(w2_ref[2], h_right, preferred_element_type=jnp.float32))
        y = y + b2_ref[...]
        y = jnp.maximum(y, 0.1 * y)                                       # LeakyReLU(0.1)

        # Residual add; stays resident in the output block for the next repeat.
        # HBM writeback happens once per group, after the last repeat.
        o_ref[...] = (x + y).astype(o_ref.dtype)

    return kernel


@jax.jit
def residual_block_pallas(x, w1_f, b1, w2_f, b2):
    """x: (N, C, L) f32.
    w1_f: (R, C//2, C) bf16   -- k=1 conv weight, BN1 scale folded in.
    b1:   (R, C//2, 1) f32    -- folded BN1 bias.
    w2_f: (R, 3, C, C//2) bf16 -- k=3 conv taps [l-1, l, l+1], BN2 scale folded.
    b2:   (R, C, 1) f32       -- folded BN2 bias."""
    n, c, length = x.shape
    r, c2 = w1_f.shape[0], w1_f.shape[1]
    nl = n * length

    # Batch-group "parallel" axis (v7x has 2 TensorCores); keep each group's
    # lane width a multiple of 128 so the output store stays unmasked.
    groups = 2 if (n % 2 == 0 and ((n // 2) * length) % 128 == 0) else 1
    gw = nl // groups

    fuse_taps = (c2 % 8 == 0)
    if fuse_taps:
        # (R, 3, C, C2) -> (R, C, 3*C2); K ordered as [tap, channel] to match
        # the in-kernel sublane concat [h_left; h_ctr; h_right].
        w2_k = jnp.transpose(w2_f, (0, 2, 1, 3)).reshape(r, c, 3 * c2)
        w2_spec = pl.BlockSpec((None, c, 3 * c2), lambda g, i: (i, 0, 0))
    else:
        w2_k = w2_f
        w2_spec = pl.BlockSpec((None, 3, c, c2), lambda g, i: (i, 0, 0, 0))

    # Layout plumbing: channels on sublanes, (batch*length) on lanes.
    x2 = jnp.transpose(x, (1, 0, 2)).reshape(c, nl)

    out2 = pl.pallas_call(
        _make_fused_kernel(length, fuse_taps),
        out_shape=jax.ShapeDtypeStruct((c, nl), x.dtype),
        grid_spec=pltpu.PrefetchScalarGridSpec(
            num_scalar_prefetch=0,
            grid=(groups, r),                                   # (batch groups, repeats)
            in_specs=[
                pl.BlockSpec((c, gw), lambda g, i: (0, g)),           # x (fetched once/group)
                pl.BlockSpec((None, c2, c), lambda g, i: (i, 0, 0)),  # w1 per repeat
                pl.BlockSpec((None, c2, 1), lambda g, i: (i, 0, 0)),  # b1
                w2_spec,                                              # w2 per repeat
                pl.BlockSpec((None, c, 1), lambda g, i: (i, 0, 0)),   # b2
            ],
            # Constant over the repeat axis -> resident accumulator block.
            out_specs=pl.BlockSpec((c, gw), lambda g, i: (0, g)),
            # Loop-invariant k=3 boundary masks (row 0: left tap, row 1: right tap).
            scratch_shapes=[pltpu.VMEM((2, gw), jnp.float32)],
        ),
        # x is only read at repeat 0 of each group; alias its HBM buffer to the
        # output (no extra activation-sized HBM allocation).
        input_output_aliases={0: 0},
        compiler_params=pltpu.CompilerParams(
            dimension_semantics=("parallel", "arbitrary")),
    )(x2, w1_f, b1, w2_k, b2)

    return jnp.transpose(out2.reshape(c, n, length), (1, 0, 2))


def make_params(key, channels, num_repeats, eps=1e-5):
    """Synthetic per-repeat parameters.  Returns (reference params list [f32],
    stacked kernel arrays) with eval-mode BN scale folded into the conv weights
    and matmul weights stored in bf16 (MXU-native operand dtype)."""
    c, c2 = channels, channels // 2
    params, w1_f, b1_s, w2_f, b2_s = [], [], [], [], []
    for rep in range(num_repeats):
        keys = jax.random.split(jax.random.fold_in(key, rep), 10)
        w1 = jax.random.normal(keys[0], (c2, c), jnp.float32) * 0.1      # Conv1d k=1
        w2 = jax.random.normal(keys[1], (c, c2, 3), jnp.float32) * 0.1   # Conv1d k=3
        g1 = 1.0 + 0.1 * jax.random.normal(keys[2], (c2,), jnp.float32)
        beta1 = 0.1 * jax.random.normal(keys[3], (c2,), jnp.float32)
        m1 = 0.1 * jax.random.normal(keys[4], (c2,), jnp.float32)
        v1 = 1.0 + 0.1 * jax.random.uniform(keys[5], (c2,), jnp.float32)
        g2 = 1.0 + 0.1 * jax.random.normal(keys[6], (c,), jnp.float32)
        beta2 = 0.1 * jax.random.normal(keys[7], (c,), jnp.float32)
        m2 = 0.1 * jax.random.normal(keys[8], (c,), jnp.float32)
        v2 = 1.0 + 0.1 * jax.random.uniform(keys[9], (c,), jnp.float32)

        s1 = g1 / jnp.sqrt(v1 + eps); bb1 = beta1 - m1 * s1
        s2 = g2 / jnp.sqrt(v2 + eps); bb2 = beta2 - m2 * s2

        params.append(dict(w1=w1, w2=w2,
                           s1=s1.reshape(c2, 1), b1=bb1.reshape(c2, 1),
                           s2=s2.reshape(c, 1), b2=bb2.reshape(c, 1)))

        # One-time host-side fold of the BN scale into the conv weights.
        w1_f.append((s1[:, None] * w1).astype(MATMUL_DTYPE))             # (C2, C)
        b1_s.append(bb1.reshape(c2, 1))
        w2_f.append(jnp.stack([s2[:, None] * w2[:, :, t] for t in range(3)],
                              axis=0).astype(MATMUL_DTYPE))              # (3, C, C2)
        b2_s.append(bb2.reshape(c, 1))

    stacked = (jnp.stack(w1_f), jnp.stack(b1_s), jnp.stack(w2_f), jnp.stack(b2_s))
    return params, stacked


def residual_block_ref(x, params):
    """Pure-JAX f32 reference of ResidualBlock forward (eval-mode BN)."""
    for p in params:
        h = jnp.einsum("oc,ncl->nol", p["w1"], x)
        h = h * p["s1"][None] + p["b1"][None]
        h = jnp.where(h >= 0, h, 0.1 * h)
        hp = jnp.pad(h, ((0, 0), (0, 0), (1, 1)))
        length = x.shape[-1]
        y = sum(jnp.einsum("oc,ncl->nol", p["w2"][:, :, j], hp[:, :, j:j + length])
                for j in range(3))
        y = y * p["s2"][None] + p["b2"][None]
        y = jnp.where(y >= 0, y, 0.1 * y)
        x = x + y
    return x


if __name__ == "__main__":
    key = jax.random.PRNGKey(0)
    # Case 1: C//2 = 4  -> 3-tap-matmul path, 2 batch groups (parallel axis).
    # Case 2: C//2 = 16 -> fused K=3*C2 matmul path, single group.
    for (N, C, L) in [(2, 8, 128), (2, 32, 64)]:
        kx, kp = jax.random.split(jax.random.fold_in(key, C))
        x = jax.random.normal(kx, (N, C, L), jnp.float32)
        params, stacked = make_params(kp, C, num_repeats=3)

        out = jax.block_until_ready(residual_block_pallas(x, *stacked))
        ref = residual_block_ref(x, params)

        assert out.shape == (N, C, L)
        # bf16 matmul operands (f32 accumulation) vs the pure-f32 reference.
        assert jnp.allclose(out, ref, atol=2e-2, rtol=2e-2), f"mismatch vs reference at C={C}"

    print("KERNEL_OK")
</pallas_src>

<mosaic_0001>
module attributes {stable_mosaic.version = 11 : i64} {
  func.func @kernel(%arg0: i32, %arg1: i32, %arg2: memref<8x128xf32, #tpu.memory_space<vmem>>, %arg3: memref<1x4x8xbf16, #tpu.memory_space<vmem>>, %arg4: memref<1x4x1xf32, #tpu.memory_space<vmem>>, %arg5: memref<1x3x8x4xbf16, #tpu.memory_space<vmem>>, %arg6: memref<1x8x1xf32, #tpu.memory_space<vmem>>, %arg7: memref<8x128xf32, #tpu.memory_space<vmem>>, %arg8: memref<2x128xf32, #tpu.memory_space<vmem>>) attributes {dimension_semantics = [#tpu.dimension_semantics<parallel>, #tpu.dimension_semantics<arbitrary>], iteration_bounds = array<i64: 2, 3>, scalar_prefetch = 0 : i64, scratch_operands = 1 : i64, tpu.core_type = #tpu.core_type<tc>, window_params = [{transform_indices = @transform_0, window_bounds = array<i64: 8, 128>}, {transform_indices = @transform_1, window_bounds = array<i64: 1, 4, 8>}, {transform_indices = @transform_2, window_bounds = array<i64: 1, 4, 1>}, {transform_indices = @transform_3, window_bounds = array<i64: 1, 3, 8, 4>}, {transform_indices = @transform_4, window_bounds = array<i64: 1, 8, 1>}, {transform_indices = @transform_5, window_bounds = array<i64: 8, 128>}]} {
    %c0_i32 = arith.constant 0 : i32
    %0 = arith.cmpi eq, %arg1, %c0_i32 : i32
    %1 = arith.extui %0 : i1 to i32
    %c0_i32_0 = arith.constant 0 : i32
    %2 = arith.cmpi ne, %1, %c0_i32_0 : i32
    scf.if %2 {
      %c0_32 = arith.constant 0 : index
      %c0_33 = arith.constant 0 : index
      %50 = vector.load %arg2[%c0_32, %c0_33] : memref<8x128xf32, #tpu.memory_space<vmem>>, vector<8x128xf32>
      %c0_34 = arith.constant 0 : index
      %c0_35 = arith.constant 0 : index
      %51 = vector.load %arg7[%c0_34, %c0_35] : memref<8x128xf32, #tpu.memory_space<vmem>>, vector<8x128xf32>
      tpu.vector_store %arg7[%c0_34, %c0_35], %50 {strides = array<i32>} : memref<8x128xf32, #tpu.memory_space<vmem>>, vector<8x128xf32>,
      %52 = tpu.iota {dimensions = array<i32: 1>} : vector<1x128xi32>
      %c128_i32 = arith.constant 128 : i32
      %c0_i32_36 = arith.constant 0 : i32
      %53 = arith.cmpi eq, %c128_i32, %c0_i32_36 : i32
      %c1_i32 = arith.constant 1 : i32
      %54 = arith.select %53, %c1_i32, %c128_i32 : i32
      %55 = vector.broadcast %54 : i32 to vector<1x128xi32>
      %56 = arith.remsi %52, %55 : vector<1x128xi32>
      %c0_i32_37 = arith.constant 0 : i32
      %57 = vector.broadcast %c0_i32_37 : i32 to vector<1x128xi32>
      %58 = arith.cmpi ne, %56, %57 : vector<1x128xi32>
      %c0_i32_38 = arith.constant 0 : i32
      %59 = vector.broadcast %c0_i32_38 : i32 to vector<1x128xi32>
      %60 = arith.cmpi slt, %56, %59 : vector<1x128xi32>
      %c0_i32_39 = arith.constant 0 : i32
      %61 = arith.cmpi slt, %54, %c0_i32_39 : i32
      %62 = vector.broadcast %61 : i1 to vector<1x128xi1>
      %63 = vector.broadcast %62 : vector<1x128xi1> to vector<1x128xi1>
      %64 = arith.xori %60, %63 : vector<1x128xi1>
      %65 = arith.andi %64, %58 : vector<1x128xi1>
      %66 = vector.broadcast %54 : i32 to vector<1x128xi32>
      %67 = arith.addi %56, %66 : vector<1x128xi32>
      %68 = arith.select %65, %67, %56 : vector<1x128xi1>, vector<1x128xi32>
      %c0_i32_40 = arith.constant 0 : i32
      %69 = vector.broadcast %c0_i32_40 : i32 to vector<1x128xi32>
      %70 = arith.cmpi ne, %68, %69 : vector<1x128xi32>
      %71 = arith.extui %70 : vector<1x128xi1> to vector<1x128xi32>
      %72 = arith.sitofp %71 : vector<1x128xi32> to vector<1x128xf32>
      %c0_41 = arith.constant 0 : index
      %c0_42 = arith.constant 0 : index
      %73 = vector.load %arg8[%c0_41, %c0_42] : memref<2x128xf32, #tpu.memory_space<vmem>>, vector<1x128xf32>
      tpu.vector_store %arg8[%c0_41, %c0_42], %72 {strides = array<i32>} : memref<2x128xf32, #tpu.memory_space<vmem>>, vector<1x128xf32>,
      %c127_i32 = arith.constant 127 : i32
      %74 = vector.broadcast %c127_i32 : i32 to vector<1x128xi32>
      %75 = arith.cmpi ne, %68, %74 : vector<1x128xi32>
      %76 = arith.extui %75 : vector<1x128xi1> to vector<1x128xi32>
      %77 = arith.sitofp %76 : vector<1x128xi32> to vector<1x128xf32>
      %c1_43 = arith.constant 1 : index
      %c0_44 = arith.constant 0 : index
      %78 = vector.load %arg8[%c1_43, %c0_44] : memref<2x128xf32, #tpu.memory_space<vmem>>, vector<1x128xf32>
      tpu.vector_store %arg8[%c1_43, %c0_44], %77 {strides = array<i32>} : memref<2x128xf32, #tpu.memory_space<vmem>>, vector<1x128xf32>,
    } else {
    }
    %c0 = arith.constant 0 : index
    %c0_1 = arith.constant 0 : index
    %3 = vector.load %arg7[%c0, %c0_1] : memref<8x128xf32, #tpu.memory_space<vmem>>, vector<8x128xf32>
    %c0_2 = arith.constant 0 : index
    %c0_3 = arith.constant 0 : index
    %c0_4 = arith.constant 0 : index
    %4 = vector.load %arg3[%c0_2, %c0_3, %c0_4] : memref<1x4x8xbf16, #tpu.memory_space<vmem>>, vector<1x4x8xbf16>
    %5 = vector.shape_cast %4 : vector<1x4x8xbf16> to vector<4x8xbf16>
    %6 = arith.truncf %3 : vector<8x128xf32> to vector<8x128xbf16>
    %cst = arith.constant dense<0.000000e+00> : vector<4x128xf32>
    %7 = tpu.matmul %5, %6, %cst {dimension_numbers = #tpu.dot_dimension_numbers<[1], [0], [0], [1], [0, 0, 1, 1], [], []>} : vector<4x8xbf16>, vector<8x128xbf16>, vector<4x128xf32> -> vector<4x128xf32>
    %c0_5 = arith.constant 0 : index
    %c0_6 = arith.constant 0 : index
    %c0_7 = arith.constant 0 : index
    %8 = vector.load %arg4[%c0_5, %c0_6, %c0_7] : memref<1x4x1xf32, #tpu.memory_space<vmem>>, vector<1x4x1xf32>
    %9 = vector.shape_cast %8 : vector<1x4x1xf32> to vector<4x1xf32>
    %10 = vector.broadcast %9 : vector<4x1xf32> to vector<4x128xf32>
    %11 = arith.addf %7, %10 : vector<4x128xf32>
    %cst_8 = arith.constant 1.000000e-01 : f32
    %12 = vector.broadcast %cst_8 : f32 to vector<4x128xf32>
    %13 = arith.mulf %12, %11 : vector<4x128xf32>
    %14 = arith.maximumf %11, %13 : vector<4x128xf32>
    %15 = vector.extract_strided_slice %14 {offsets = [0, 127], sizes = [4, 1], strides = [1, 1]} : vector<4x128xf32> to vector<4x1xf32>
    %16 = vector.extract_strided_slice %14 {offsets = [0, 0], sizes = [4, 127], strides = [1, 1]} : vector<4x128xf32> to vector<4x127xf32>
    %17 = tpu.concatenate %15, %16 in 1 : vector<4x1xf32>, vector<4x127xf32> -> vector<4x128xf32>
    %c0_9 = arith.constant 0 : index
    %c0_10 = arith.constant 0 : index
    %18 = vector.load %arg8[%c0_9, %c0_10] : memref<2x128xf32, #tpu.memory_space<vmem>>, vector<1x128xf32>
    %19 = vector.broadcast %18 : vector<1x128xf32> to vector<4x128xf32>
    %20 = arith.mulf %17, %19 : vector<4x128xf32>
    %21 = arith.truncf %20 : vector<4x128xf32> to vector<4x128xbf16>
    %22 = arith.truncf %14 : vector<4x128xf32> to vector<4x128xbf16>
    %23 = vector.extract_strided_slice %14 {offsets = [0, 1], sizes = [4, 127], strides = [1, 1]} : vector<4x128xf32> to vector<4x127xf32>
    %24 = vector.extract_strided_slice %14 {offsets = [0, 0], sizes = [4, 1], strides = [1, 1]} : vector<4x128xf32> to vector<4x1xf32>
    %25 = tpu.concatenate %23, %24 in 1 : vector<4x127xf32>, vector<4x1xf32> -> vector<4x128xf32>
    %c1 = arith.constant 1 : index
    %c0_11 = arith.constant 0 : index
    %26 = vector.load %arg8[%c1, %c0_11] : memref<2x128xf32, #tpu.memory_space<vmem>>, vector<1x128xf32>
    %27 = vector.broadcast %26 : vector<1x128xf32> to vector<4x128xf32>
    %28 = arith.mulf %25, %27 : vector<4x128xf32>
    %29 = arith.truncf %28 : vector<4x128xf32> to vector<4x128xbf16>
    %c0_12 = arith.constant 0 : index
    %c0_13 = arith.constant 0 : index
    %c0_14 = arith.constant 0 : index
    %c0_15 = arith.constant 0 : index
    %30 = vector.load %arg5[%c0_12, %c0_13, %c0_14, %c0_15] : memref<1x3x8x4xbf16, #tpu.memory_space<vmem>>, vector<1x1x8x4xbf16>
    %31 = vector.shape_cast %30 : vector<1x1x8x4xbf16> to vector<8x4xbf16>
    %cst_16 = arith.constant dense<0.000000e+00> : vector<8x128xf32>
    %32 = tpu.matmul %31, %21, %cst_16 {dimension_numbers = #tpu.dot_dimension_numbers<[1], [0], [0], [1], [0, 0, 1, 1], [], []>} : vector<8x4xbf16>, vector<4x128xbf16>, vector<8x128xf32> -> vector<8x128xf32>
    %c0_17 = arith.constant 0 : index
    %c1_18 = arith.constant 1 : index
    %c0_19 = arith.constant 0 : index
    %c0_20 = arith.constant 0 : index
    %33 = vector.load %arg5[%c0_17, %c1_18, %c0_19, %c0_20] : memref<1x3x8x4xbf16, #tpu.memory_space<vmem>>, vector<1x1x8x4xbf16>
    %34 = vector.shape_cast %33 : vector<1x1x8x4xbf16> to vector<8x4xbf16>
    %cst_21 = arith.constant dense<0.000000e+00> : vector<8x128xf32>
    %35 = tpu.matmul %34, %22, %cst_21 {dimension_numbers = #tpu.dot_dimension_numbers<[1], [0], [0], [1], [0, 0, 1, 1], [], []>} : vector<8x4xbf16>, vector<4x128xbf16>, vector<8x128xf32> -> vector<8x128xf32>
    %36 = arith.addf %32, %35 : vector<8x128xf32>
    %c0_22 = arith.constant 0 : index
    %c2 = arith.constant 2 : index
    %c0_23 = arith.constant 0 : index
    %c0_24 = arith.constant 0 : index
    %37 = vector.load %arg5[%c0_22, %c2, %c0_23, %c0_24] : memref<1x3x8x4xbf16, #tpu.memory_space<vmem>>, vector<1x1x8x4xbf16>
    %38 = vector.shape_cast %37 : vector<1x1x8x4xbf16> to vector<8x4xbf16>
    %cst_25 = arith.constant dense<0.000000e+00> : vector<8x128xf32>
    %39 = tpu.matmul %38, %29, %cst_25 {dimension_numbers = #tpu.dot_dimension_numbers<[1], [0], [0], [1], [0, 0, 1, 1], [], []>} : vector<8x4xbf16>, vector<4x128xbf16>, vector<8x128xf32> -> vector<8x128xf32>
    %40 = arith.addf %36, %39 : vector<8x128xf32>
    %c0_26 = arith.constant 0 : index
    %c0_27 = arith.constant 0 : index
    %c0_28 = arith.constant 0 : index
    %41 = vector.load %arg6[%c0_26, %c0_27, %c0_28] : memref<1x8x1xf32, #tpu.memory_space<vmem>>, vector<1x8x1xf32>
    %42 = vector.shape_cast %41 : vector<1x8x1xf32> to vector<8x1xf32>
    %43 = vector.broadcast %42 : vector<8x1xf32> to vector<8x128xf32>
    %44 = arith.addf %40, %43 : vector<8x128xf32>
    %cst_29 = arith.constant 1.000000e-01 : f32
    %45 = vector.broadcast %cst_29 : f32 to vector<8x128xf32>
    %46 = arith.mulf %45, %44 : vector<8x128xf32>
    %47 = arith.maximumf %44, %46 : vector<8x128xf32>
    %48 = arith.addf %3, %47 : vector<8x128xf32>
    %c0_30 = arith.constant 0 : index
    %c0_31 = arith.constant 0 : index
    %49 = vector.load %arg7[%c0_30, %c0_31] : memref<8x128xf32, #tpu.memory_space<vmem>>, vector<8x128xf32>
    tpu.vector_store %arg7[%c0_30, %c0_31], %48 {strides = array<i32>} : memref<8x128xf32, #tpu.memory_space<vmem>>, vector<8x128xf32>,
    return
  }
  func.func @transform_0(%arg0: i32, %arg1: i32) -> (i32, i32) {
    %c0_i32 = arith.constant 0 : i32
    %c0_i32_0 = arith.constant 0 : i32
    return %c0_i32, %arg0 : i32, i32
  }
  func.func @transform_1(%arg0: i32, %arg1: i32) -> (i32, i32, i32) {
    %c0_i32 = arith.constant 0 : i32
    %c0_i32_0 = arith.constant 0 : i32
    %c0_i32_1 = arith.constant 0 : i32
    return %arg1, %c0_i32, %c0_i32_0 : i32, i32, i32
  }
  func.func @transform_2(%arg0: i32, %arg1: i32) -> (i32, i32, i32) {
    %c0_i32 = arith.constant 0 : i32
    %c0_i32_0 = arith.constant 0 : i32
    %c0_i32_1 = arith.constant 0 : i32
    return %arg1, %c0_i32, %c0_i32_0 : i32, i32, i32
  }
  func.func @transform_3(%arg0: i32, %arg1: i32) -> (i32, i32, i32, i32) {
    %c0_i32 = arith.constant 0 : i32
    %c0_i32_0 = arith.constant 0 : i32
    %c0_i32_1 = arith.constant 0 : i32
    %c0_i32_2 = arith.constant 0 : i32
    return %arg1, %c0_i32, %c0_i32_0, %c0_i32_1 : i32, i32, i32, i32
  }
  func.func @transform_4(%arg0: i32, %arg1: i32) -> (i32, i32, i32) {
    %c0_i32 = arith.constant 0 : i32
    %c0_i32_0 = arith.constant 0 : i32
    %c0_i32_1 = arith.constant 0 : i32
    return %arg1, %c0_i32, %c0_i32_0 : i32, i32, i32
  }
  func.func @transform_5(%arg0: i32, %arg1: i32) -> (i32, i32) {
    %c0_i32 = arith.constant 0 : i32
    %c0_i32_0 = arith.constant 0 : i32
    return %c0_i32, %arg0 : i32, i32
  }
}

</mosaic_0001>

<bundles_post_ra>
// kernel: residual_block_pallas.1
= control target key start
LH: loop header
LB: loop body
LE: loop exit
PB: predicated region body
PF: predicated region fallthrough
CT: control target
= control target key end

     0   :  { %s863_s18 = smov 0   ;;  %s865_s19 = smov 0   ;;  %s962_s0 = inlined_call_operand.vmem [shape: f32[8,256], index: 0, kind: input, shape index: {}, may-alias: {0,5}]   ;;  %s963_s1 = inlined_call_operand.vmem [shape: bf16[3,4,8], index: 1, kind: input, shape index: {}]   ;;  %s964_s2 = inlined_call_operand.vmem [shape: f32[3,4,1], index: 2, kind: input, shape index: {}]   ;;  %s965_s3 = inlined_call_operand.vmem [shape: bf16[3,3,8,4], index: 3, kind: input, shape index: {}]   ;;  %s966_s4 = inlined_call_operand.vmem [shape: f32[3,8,1], index: 4, kind: input, shape index: {}]   ;;  %s967_s5 = inlined_call_operand.vmem [shape: f32[8,256], index: 5, kind: output, shape index: {}, may-alias: {0,5}]  }
   0x1   :  { %s867_s20 = smov 0   ;;  %s869_s21 = smov 0  }
   0x2   :  { %s871_s22 = smov 0  }
   0x3 LB: > { %s24_s23 = sadd.s32 1, %s817_s20  ;;  %s27_s24 = sadd.s32 1, %s821_s21  ;;  %s825_s22 = sphi %s871_s22, %s15_s22   ;;  %s821_s21 = sphi %s869_s21, %s971_s21   ;;  %s817_s20 = sphi %s867_s20, %s970_s20   ;;  %s813_s19 = sphi %s865_s19, %s969_s19   ;;  %s809_s18 = sphi %s863_s18, %s968_s18  }
   0x4   : > { %p25_p0 = scmp.ge.s32.totalorder %s24_s23, 3  ;;  %p686_p1 = scmp.ge.s32.totalorder %s825_s22, 1 }
   0x5   : > { %p235_p2 = scmp.lt.s32.totalorder %s825_s22, 7 }
   0x6   : > { %s973_s23 = smov (%p25_p0, %s24_s23), 0  ;;  %s975_s24 = smov (!%p25_p0, %s27_s24), %s821_s21 }
   0x7   : > { %p236_p3 = pnand %p686_p1, %p235_p2  ;;  %p29_p4 = scmp.ge.s32.totalorder %s975_s24, 2 }
   0x8   : > { %p278_p5 = scmp.lt.s32.totalorder (!%p236_p3), %s813_s19, 1  ;;  %p282_p6 = scmp.lt.s32.totalorder (!%p236_p3), %s809_s18, 2 }
   0x9   : > { %s977_s24 = smov (%p29_p4, %s975_s24), 0  ;;  %239 = sbr.rel (%p236_p3) target bundleno = 603 (0x25b), region = 40 }
   0xa   : > { %p693_p7 = scmp.ne.s32.totalorder (!%p236_p3), %s809_s18, 0 }
  0x10   : > { %s979_s19 = smov (!%p278_p5, %s813_s19), 1  ;;  %v310_v1 = vlaneseq (!%p693_p7)  ;;  %v827_v3 = vmov (!%p693_p7), 0.0  }
  0x11   : > { %s283_s25 = scalar_select %p282_p6, %s809_s18, 2 }
  0x12   : > { %s687_s26 = sshll.u32 %s979_s19, 3  ;;  %307 = sbr.rel (%p693_p7) target bundleno = 25 (0x19), region = 44  ;;  %v311_v2 = vand.u32 (!%p693_p7), 127, %v310_v1 }
  0x13   : > { %s281_s29 = scalar_lea.vmem %s962_s0, %s687_s26  ;;  %s688_s30 = sshll.u32 %s283_s25, 1 }
  0x14   : > { %s903_s8 = scalar_lea.vmem %s963_s1, %s688_s30  ;;  %s689_s9 = sshll.u32 %s283_s25, 2  ;;  %v308_v0 = vld [vmem:[%s281_s29] sm:$0xff] (!%p693_p7)  ;;  %vm324_vm0 = vcmp.ne.s32.totalorder (!%p693_p7), %v311_v2, 0  ;;  %vm328_vm1 = vcmp.ne.s32.totalorder (!%p693_p7), %v311_v2, 127 }
  0x15   : > { %s289_s12 = scalar_lea.vmem %s964_s2, %s689_s9  ;;  %s738_s13 = smul.u32 12, %s283_s25  ;;  %v694_v4 = vsel (!%p693_p7), %vm324_vm0, 1.0, %v827_v3  ;;  %v695_v5 = vsel (!%p693_p7), %vm328_vm1, 1.0, %v827_v3 }
  0x16   : > { %s691_s14 = sshll.u32 %s283_s25, 3  ;;  %s911_s17 = scalar_lea.vmem %s967_s5, %s687_s26  ;;  %327 = vst [vmem:[#allocation2] sm:$0x1] (!%p693_p7), %v694_v4  ;;  %331 = vst [vmem:[#allocation2 + $0x1] sm:$0x1] (!%p693_p7), %v695_v5 }
  0x17   : > { %s916_s28 = scalar_lea.vmem %s965_s3, %s738_s13  ;;  %s921_s7 = scalar_lea.vmem %s966_s4, %s691_s14  ;;  %309 = vst [vmem:[%s911_s17] sm:$0xff] (!%p693_p7), %v308_v0 }
  0x19 PF: > { %vm345_vm2 = vcmask 1043456   ;;  %v828_v7 = vmov 0.0   ;;  %vm829_vm3 = vmmov 0   ;;  %v335_v9 = vld [vmem:[%s289_s12] sm:$0xf]  ;;  %v830_v10 = vmov 0  }
  0x1a   : > { %714 = vmatprep.subr.bf16.mxu0 %v828_v7  ;;  %716 = vmatprep.mubr.msk.bf16.mxu0 %vm829_vm3, %v828_v7  ;;  %v333_v12 = vld [vmem:[%s903_s8] sm:$0x3]  ;;  %vm341_vm4 = vcmask 64512   ;;  %vm420_vm5 = vcmask 1041408   ;;  %s831_s18 = smov 127   ;;  %s832_s25 = smov 1  }
  0x1b   : > { %785 = vset.pattern.permute.xlu0 %v830_v10  ;;  %720 = vmatprep.subr.bf16.mxu1 %v828_v7  ;;  %v559_v22 = vld [vmem:[%s921_s7] sm:$0xff]  ;;  %vm416_vm6 = vcmask 31744   ;;  %v702_v36 = vld [vmem:[%s916_s28 + $0x8] sm:$0xf] }
  0x1c   : > { %338 = vperm.xlu0 %785, %v335_v9   ;;  %722 = vmatprep.mubr.msk.bf16.mxu1 %vm829_vm3, %v828_v7  ;;  %v699_v24 = vld [vmem:[%s916_s28 + $0x4] sm:$0xf]  ;;  %v413_v35 = vld [vmem:[%s916_s28] sm:$0xf] }
  0x1d   : > { %786 = vset.pattern.permute.xlu1 %v830_v10  ;;  %v698_v25 = vld [vmem:[#allocation2 + $0x1] ss:$0 sm:$0xff]  ;;  %v697_v26 = vld [vmem:[#allocation2] ss:$0 sm:$0xff] }
  0x1e   : > { %v926_v6 = vld [vmem:[%s911_s17] sm:$0xff] }
  0x1f   : > { %v334_v8 = vpack.c.bf16 %v926_v6, %v926_v6 }
  0x21   : > { %v347_v11 = vsel %vm345_vm2, %v334_v8, 0 }
  0x22   : > { %715 = vmatpush3.bf16.msra.mxu0 %v347_v11 }
  0x23   : > { %726 = vmatprep.subr.bf16.mxu0 %v828_v7 }
  0x25   : > { %717 = vmatmul.mubr.msk.bf16.vlgmr.msra.gmra.mrb[0].mxu0 %vm341_vm4, %v333_v12 }
  0x26   : > { %728 = vmatprep.mubr.msk.bf16.mxu0 %vm829_vm3, %v828_v7 }
  0x9b   : > { %v339_v13 = vpop.permute.xlu0 %338 }
  0xf8   : > { %v383_v14 = vpop.f32.mrb[0].mxu0 }
  0xf9   : > { %v384_v15 = vadd.f32 %v383_v14, %v339_v13  ;;  %v718_v16 = vpop.f32.mrb[1].mxu0 }
  0xfa   : > { %v386_v17 = vpop.f32.mrb[2].mxu0 }
  0xfb   : > { %v389_v18 = vmul.f32 0.1, %v384_v15  ;;  %v719_v19 = vpop.f32.mrb[3].mxu0 }
  0xfd   : > { %v390_v20 = vmax.f32 %v384_v15, %v389_v18 }
  0xff   : > { %403 = vrot.lane.b32.xlu1 %v390_v20, %s831_s18  ;;  %392 = vrot.lane.b32.xlu0 %v390_v20, %s832_s25  ;;  %v402_v21 = vpack.c.bf16 %v390_v20, %v390_v20 }
 0x101   : > { %v422_v23 = vsel %vm420_vm5, %v402_v21, 0 }
 0x102   : > { %721 = vmatpush3.bf16.msra.mxu1 %v422_v23 }
 0x103   : > { %732 = vmatprep.subr.bf16.mxu1 %v828_v7  ;;  %562 = vperm.xlu1 %786, %v559_v22  }
 0x105   : > { %723 = vmatmul.mubr.msk.bf16.vlgmr.msra.gmra.mrb[0].mxu1 %vm416_vm6, %v699_v24 }
 0x106   : > { %734 = vmatprep.mubr.msk.bf16.mxu1 %vm829_vm3, %v828_v7 }
 0x171   : > { %v404_v27 = vpop.permute.xlu1 %403  ;;  %v393_v28 = vpop.permute.xlu0 %392 }
 0x172   : > { %v411_v29 = vmul.f32 %v698_v25, %v404_v27  ;;  %v400_v30 = vmul.f32 %v697_v26, %v393_v28 }
 0x174   : > { %v412_v31 = vpack.c.bf16 %v411_v29, %v411_v29  ;;  %v401_v32 = vpack.c.bf16 %v400_v30, %v400_v30 }
 0x176   : > { %v516_v33 = vsel %vm420_vm5, %v412_v31, 0  ;;  %v468_v34 = vsel %vm420_vm5, %v401_v32, 0 }
 0x177   : > { %727 = vmatpush3.bf16.msra.mxu0 %v468_v34  ;;  %733 = vmatpush3.bf16.msra.mxu1 %v516_v33 }
 0x17a   : > { %729 = vmatmul.mubr.msk.bf16.vlgmr.msra.gmra.mrb[4].mxu0 %vm416_vm6, %v413_v35  ;;  %735 = vmatmul.mubr.msk.bf16.vlgmr.msra.gmra.mrb[4].mxu1 %vm416_vm6, %v702_v36 }
 0x182   : > { %v563_v41 = vpop.permute.xlu1 %562 }
 0x1d8   : > { %v458_v37 = vpop.f32.mrb[0].mxu1 }
 0x1d9   : > { %v724_v38 = vpop.f32.mrb[1].mxu1 }
 0x1da   : > { %v461_v39 = vpop.f32.mrb[2].mxu1 }
 0x1db   : > { %v725_v40 = vpop.f32.mrb[3].mxu1 }
 0x24d   : > { %v504_v42 = vpop.f32.mrb[4].mxu0  ;;  %v552_v43 = vpop.f32.mrb[4].mxu1 }
 0x24e   : > { %v505_v44 = vadd.f32 %v504_v42, %v458_v37  ;;  %v730_v45 = vpop.f32.mrb[5].mxu0  ;;  %v736_v46 = vpop.f32.mrb[5].mxu1 }
 0x24f   : > { %v507_v47 = vpop.f32.mrb[6].mxu0  ;;  %v555_v48 = vpop.f32.mrb[6].mxu1 }
 0x250   : > { %v558_v49 = vadd.f32 %v552_v43, %v505_v44  ;;  %v731_v50 = vpop.f32.mrb[7].mxu0  ;;  %v737_v51 = vpop.f32.mrb[7].mxu1 }
 0x252   : > { %v565_v52 = vadd.f32 %v563_v41, %v558_v49 }
 0x254   : > { %v566_v53 = vmul.f32 0.1, %v565_v52 }
 0x256   : > { %v567_v54 = vmax.f32 %v565_v52, %v566_v53 }
 0x258   : > { %v568_v55 = vadd.f32 %v567_v54, %v926_v6 }
 0x25a   : > { %569 = vst [vmem:[%s911_s17] sm:$0xff] %v568_v55 }
 0x25b PF: > { %s15_s22 = sadd.s32 1, %s825_s22   ;;  %s968_s18 = smov %s817_s20 }
 0x25c   : > { %p12_p8 = scmp.ge.s32.totalorder %s15_s22, 8   ;;  %s969_s19 = smov %s821_s21 }
 0x25d   : > { %s970_s20 = smov %s973_s23  ;;  %s971_s21 = smov %s977_s24 }
 0x25e   :  { %14 = sbr.rel (!%p12_p8) target bundleno = 3 (0x3), region = 88 }

</bundles_post_ra>
